<compile_context>
chip_gen: v7x
topology: tpu7x:2x2x1
jax: 0.10.0
libtpu: 0.0.40
codegen_flags: <defaults>
</compile_context>

<pallas_src>
import jax
import jax.numpy as jnp
from jax.experimental import pallas as pl
from jax.experimental.pallas import tpu as pltpu

N_STATES = 4
N_HIDDEN = 50
N_ACTIONS = 10

X_PAD = 8                      # x columns padded 4 -> 8 (col 4 is the ones column)
HID_PAD = 128                  # hidden dim padded to full lane width
BIAS_LANE = N_HIDDEN           # hidden unit 50 is the fc2 bias carrier (==1 after relu)

# Row layout of the packed parameter slab (P_ROWS x 128, f32):
W1_ROW = 0                     # rows [0, 4)    : w1 (4, 50) zero-padded to 128 lanes
B1_ROW = N_STATES              # row 4          : b1 (50,) padded; lane 50 = 1.0 (bias carrier)
W2_ROW = X_PAD                 # rows [8, 136)  : w2 (50, 10) padded; row 8+50 = b2
P_ROWS = X_PAD + HID_PAD       # 136, multiple of 8 sublanes


def _round_up(n, m):
    return ((n + m - 1) // m) * m


def _net_kernel(x_ref, p_ref, o_ref):
    x8 = x_ref[...]                                            # (tb, 8); column 4 == 1.0

    # fc1 + b1 on the MXU (bias folded in via the ones column).
    h = jnp.dot(x8, p_ref[W1_ROW:W1_ROW + X_PAD, :],
                preferred_element_type=jnp.float32)
    h = jnp.maximum(h, 0.0)                                    # (tb, 128); lane 50 == 1, lanes 51.. == 0

    # fc2 + b2 on the MXU (bias folded in via hidden bias-lane 50).
    o = jnp.dot(h, p_ref[W2_ROW:W2_ROW + HID_PAD, :],
                preferred_element_type=jnp.float32)            # (tb, 128); lanes >= 10 are exact zeros

    o_ref[...] = o[:, :N_ACTIONS].astype(o_ref.dtype)          # narrow (tb, 10) store, no amplification


def pack_params(w1, b1, w2, b2):
    """Pack (w1:(4,50), b1:(50,), w2:(50,10), b2:(10,)) into one (136,128) f32 slab."""
    slab = jnp.zeros((P_ROWS, HID_PAD), jnp.float32)
    slab = slab.at[W1_ROW:W1_ROW + N_STATES, 0:N_HIDDEN].set(w1.astype(jnp.float32))
    slab = slab.at[B1_ROW, 0:N_HIDDEN].set(b1.astype(jnp.float32))
    slab = slab.at[B1_ROW, BIAS_LANE].set(1.0)                 # makes h[:, 50] == 1.0 after relu
    slab = slab.at[W2_ROW:W2_ROW + N_HIDDEN, 0:N_ACTIONS].set(w2.astype(jnp.float32))
    slab = slab.at[W2_ROW + BIAS_LANE, 0:N_ACTIONS].set(b2.astype(jnp.float32))
    return slab


def _choose_batch_tile(B, batch_tile):
    tb = min(batch_tile, _round_up(B, 8))
    # v7x megacore: a single-step grid cannot shard the "parallel" axis across
    # the two TensorCores; force >= 2 steps once the batch is large enough.
    if B >= 1024 and pl.cdiv(B, tb) < 2:
        tb = _round_up(pl.cdiv(B, 2), 8)
    return tb


def net_forward(x, params_slab, *, batch_tile=2048):
    """x: (B, N_STATES) f32, params_slab: (P_ROWS, 128) f32 from pack_params().
    Returns actions_value: (B, N_ACTIONS) f32."""
    B = x.shape[0]

    # Ones-column bias trick: (B, 4) -> (B, 8) with 1.0 in column 4, zeros in 5-7.
    x8 = jnp.concatenate(
        [x.astype(jnp.float32),
         jnp.ones((B, 1), jnp.float32),
         jnp.zeros((B, X_PAD - N_STATES - 1), jnp.float32)],
        axis=1)

    tb = _choose_batch_tile(B, batch_tile)
    grid = (pl.cdiv(B, tb),)          # no host-side row padding; partial final block handled by Pallas

    out = pl.pallas_call(
        _net_kernel,
        out_shape=jax.ShapeDtypeStruct((B, N_ACTIONS), jnp.float32),
        grid=grid,
        in_specs=[
            pl.BlockSpec((tb, X_PAD), lambda i: (i, 0)),        # batch tile of x
            # Constant block index -> params slab fetched once and kept resident.
            pl.BlockSpec((P_ROWS, HID_PAD), lambda i: (0, 0)),
        ],
        out_specs=pl.BlockSpec((tb, N_ACTIONS), lambda i: (i, 0)),
        compiler_params=pltpu.CompilerParams(
            dimension_semantics=("parallel",),                  # shard batch across TCs on v7x
        ),
    )(x8, params_slab)

    return out


def init_params(key):
    """Weights ~ N(0, 0.1) like the PyTorch module; biases ~ PyTorch Linear default."""
    k1, k2, k3, k4 = jax.random.split(key, 4)
    w1 = 0.1 * jax.random.normal(k1, (N_STATES, N_HIDDEN), jnp.float32)
    b1 = jax.random.uniform(k2, (N_HIDDEN,), jnp.float32, -1.0, 1.0) / jnp.sqrt(float(N_STATES))
    w2 = 0.1 * jax.random.normal(k3, (N_HIDDEN, N_ACTIONS), jnp.float32)
    b2 = jax.random.uniform(k4, (N_ACTIONS,), jnp.float32, -1.0, 1.0) / jnp.sqrt(float(N_HIDDEN))
    return w1, b1, w2, b2


def reference_forward(x, w1, b1, w2, b2):
    h = jnp.maximum(x @ w1 + b1, 0.0)
    return h @ w2 + b2


if __name__ == "__main__":
    key = jax.random.PRNGKey(0)
    kp, kx1, kx2, kx3 = jax.random.split(key, 4)

    w1, b1, w2, b2 = init_params(kp)
    slab = pack_params(w1, b1, w2, b2)

    # Small DQN-style batch (single grid step).
    B = 8
    x = jax.random.normal(kx1, (B, N_STATES), jnp.float32)
    out = jax.block_until_ready(net_forward(x, slab))
    ref = reference_forward(x, w1, b1, w2, b2)
    assert out.shape == (B, N_ACTIONS)
    assert jnp.allclose(out, ref, atol=1e-4, rtol=1e-4), "mismatch vs reference (B=8)"

    # Non-multiple-of-8 batch -> exercises the partial final block (no host row pad).
    B2 = 300
    x2 = jax.random.normal(kx2, (B2, N_STATES), jnp.float32)
    out2 = jax.block_until_ready(net_forward(x2, slab))
    ref2 = reference_forward(x2, w1, b1, w2, b2)
    assert out2.shape == (B2, N_ACTIONS)
    assert jnp.allclose(out2, ref2, atol=1e-4, rtol=1e-4), "mismatch vs reference (B=300)"

    # Larger batch -> exercises the forced >=2 grid steps (v7x megacore path).
    B3 = 1500
    x3 = jax.random.normal(kx3, (B3, N_STATES), jnp.float32)
    out3 = jax.block_until_ready(net_forward(x3, slab))
    ref3 = reference_forward(x3, w1, b1, w2, b2)
    assert out3.shape == (B3, N_ACTIONS)
    assert jnp.allclose(out3, ref3, atol=1e-4, rtol=1e-4), "mismatch vs reference (B=1500)"

    print("KERNEL_OK")
</pallas_src>

<mosaic_0001>
module attributes {stable_mosaic.version = 11 : i64} {
  func.func @_net_kernel(%arg0: i32, %arg1: memref<8x8xf32, #tpu.memory_space<vmem>>, %arg2: memref<136x128xf32, #tpu.memory_space<vmem>>, %arg3: memref<8x10xf32, #tpu.memory_space<vmem>>) attributes {dimension_semantics = [#tpu.dimension_semantics<parallel>], iteration_bounds = array<i64: 1>, scalar_prefetch = 0 : i64, scratch_operands = 0 : i64, tpu.core_type = #tpu.core_type<tc>, window_params = [{transform_indices = @transform_0, window_bounds = array<i64: 8, 8>}, {pipeline_mode = #tpu.pipeline_mode<synchronous>, transform_indices = @transform_1, window_bounds = array<i64: 136, 128>}, {transform_indices = @transform_2, window_bounds = array<i64: 8, 10>}]} {
    %c0 = arith.constant 0 : index
    %c0_0 = arith.constant 0 : index
    %0 = vector.load %arg1[%c0, %c0_0] : memref<8x8xf32, #tpu.memory_space<vmem>>, vector<8x8xf32>
    %c0_1 = arith.constant 0 : index
    %c0_2 = arith.constant 0 : index
    %1 = vector.load %arg2[%c0_1, %c0_2] : memref<136x128xf32, #tpu.memory_space<vmem>>, vector<8x128xf32>
    %cst = arith.constant dense<0.000000e+00> : vector<8x128xf32>
    %2 = tpu.matmul %0, %1, %cst {dimension_numbers = #tpu.dot_dimension_numbers<[1], [0], [0], [1], [0, 0, 1, 1], [], []>} : vector<8x8xf32>, vector<8x128xf32>, vector<8x128xf32> -> vector<8x128xf32>
    %cst_3 = arith.constant 0.000000e+00 : f32
    %3 = vector.broadcast %cst_3 : f32 to vector<8x128xf32>
    %4 = arith.maximumf %2, %3 : vector<8x128xf32>
    %c8 = arith.constant 8 : index
    %c0_4 = arith.constant 0 : index
    %5 = vector.load %arg2[%c8, %c0_4] : memref<136x128xf32, #tpu.memory_space<vmem>>, vector<128x128xf32>
    %cst_5 = arith.constant dense<0.000000e+00> : vector<8x128xf32>
    %6 = tpu.matmul %4, %5, %cst_5 {dimension_numbers = #tpu.dot_dimension_numbers<[1], [0], [0], [1], [0, 0, 1, 1], [], []>} : vector<8x128xf32>, vector<128x128xf32>, vector<8x128xf32> -> vector<8x128xf32>
    %7 = vector.extract_strided_slice %6 {offsets = [0, 0], sizes = [8, 10], strides = [1, 1]} : vector<8x128xf32> to vector<8x10xf32>
    %c0_6 = arith.constant 0 : index
    %c0_7 = arith.constant 0 : index
    %8 = vector.load %arg3[%c0_6, %c0_7] : memref<8x10xf32, #tpu.memory_space<vmem>>, vector<8x10xf32>
    tpu.vector_store %arg3[%c0_6, %c0_7], %7 {strides = array<i32>} : memref<8x10xf32, #tpu.memory_space<vmem>>, vector<8x10xf32>,
    return
  }
  func.func @transform_0(%arg0: i32) -> (i32, i32) {
    %c0_i32 = arith.constant 0 : i32
    %c0_i32_0 = arith.constant 0 : i32
    return %arg0, %c0_i32 : i32, i32
  }
  func.func @transform_1(%arg0: i32) -> (i32, i32) {
    %c0_i32 = arith.constant 0 : i32
    %c0_i32_0 = arith.constant 0 : i32
    %c0_i32_1 = arith.constant 0 : i32
    return %c0_i32, %c0_i32_0 : i32, i32
  }
  func.func @transform_2(%arg0: i32) -> (i32, i32) {
    %c0_i32 = arith.constant 0 : i32
    %c0_i32_0 = arith.constant 0 : i32
    return %arg0, %c0_i32 : i32, i32
  }
}

</mosaic_0001>

<bundles_post_ra>
// kernel: tpu_custom_call.1
= control target key start
LH: loop header
LB: loop body
LE: loop exit
PB: predicated region body
PF: predicated region fallthrough
CT: control target
= control target key end

     0   :  { %7 = vsyncpa [#allocation3], 0  ;;  %s449_s0 = inlined_call_operand.hbm [shape: f32[8,8], index: 0, kind: input, shape index: {}]   ;;  %s450_s1 = inlined_call_operand.hbm [shape: f32[136,128], index: 1, kind: input, shape index: {}]   ;;  %s451_s2 = inlined_call_operand.hbm [shape: f32[8,10], index: 2, kind: output, shape index: {}]  }
   0x1   :  { %8 = vsyncpa [#allocation6], 0 }
   0x2   :  { %9 = vsyncpa [#allocation4], 0  ;;  %s383_s9 = smov [#allocation2]   ;;  %s384_s11 = smov [#allocation5]  }
   0x3   :  { %s16_s10 = sshll.u32 %s383_s9, 4  ;;  %s25_s12 = sshll.u32 %s384_s11, 4  ;;  %s17_s10 = int_to_ptr.vmem [resolvable:$true] %s16_s10  ;;  %s406_s12 = int_to_ptr.vmem [resolvable:$true] %s25_s12 }
   0x4   :  { %s311_s15 = scalar_lea.hbm %s449_s0, 128 }
   0x5   :  { %p312_p0 = scmp.ne.s32.totalorder %s449_s0, %s311_s15  ;;  %p315_p1 = scmp.lt.u32.totalorder %s311_s15, %s449_s0 }
   0x7   :  { %p317_p2 = pnand %p315_p1, %p312_p0 }
   0x9   :  { %320 = shalt.err (!%p317_p2)
}
   0xa   :  { %s321_s20 = scalar_lea.vmem %s17_s10, 128  ;;  %p326_p4 = scmp.lt.s32.totalorder %s17_s10, %s17_s10 }
   0xb   :  { %p322_p3 = scmp.ne.s32.totalorder %s17_s10, %s321_s20  ;;  %p327_p5 = scmp.lt.s32.totalorder %s321_s20, %s321_s20 }
   0xd   :  { %p328_p6 = por %p327_p5, %p326_p4 }
   0xf   :  { %p329_p7 = pnand %p328_p6, %p322_p3 }
  0x11   :  { %332 = shalt.err (!%p329_p7)
}
  0x12   :  { %19 = dma.hbm_to_vmem [thread:$0]  %s449_s0, 128, %s17_s10, [#allocation3]  }
  0x13   :  { %s333_s25 = scalar_lea.hbm %s450_s1, 2176 }
  0x14   :  { %p334_p8 = scmp.ne.s32.totalorder %s450_s1, %s333_s25  ;;  %p337_p9 = scmp.lt.u32.totalorder %s333_s25, %s450_s1 }
  0x16   :  { %p339_p10 = pnand %p337_p9, %p334_p8 }
  0x18   :  { %342 = shalt.err (!%p339_p10)
}
  0x19   :  { %s343_s30 = scalar_lea.vmem %s406_s12, 2176  ;;  %p348_p12 = scmp.lt.s32.totalorder %s406_s12, %s406_s12 }
  0x1a   :  { %p344_p11 = scmp.ne.s32.totalorder %s406_s12, %s343_s30  ;;  %p349_p13 = scmp.lt.s32.totalorder %s343_s30, %s343_s30 }
  0x1c   :  { %p350_p0 = por %p349_p13, %p348_p12 }
  0x1e   :  { %p351_p1 = pnand %p350_p0, %p344_p11 }
  0x20   :  { %354 = shalt.err (!%p351_p1)
}
  0x21   :  { %s385_s0 = smov 128   ;;  %s386_s3 = smov 8  }
  0x22   :  { %31 = dma.hbm_to_vmem [thread:$0]  %s450_s1, 2176, %s406_s12, [#allocation6], %s385_s0, %s385_s0, %s386_s3  }
  0x23   :  { %377 = dma.done.wait [#allocation3], 128  }
  0x24   :  { %378 = vsyncadd [#allocation3], 4294967168 }
  0x25   :  { %379 = dma.done.wait [#allocation6], 2176  }
  0x26   :  { %380 = vsyncadd [#allocation6], 4294965120  ;;  %v387_v0 = vmov 0.0   ;;  %vm388_vm0 = vmmov 0   ;;  %v389_v1 = vmov 0.0|0.0   ;;  %vm40_vm1 = vcmask 64512  }
  0x27   :  { %239 = vmatprep.subr.mxu0 %v387_v0  ;;  %241 = vmatprep.mubr.msk.f32.mxu0 %vm388_vm0, %v387_v0  ;;  %v39_v2 = vld [vmem:[#allocation5] sm:$0xff]  ;;  %v38_v3 = vld [vmem:[#allocation2] sm:$0xff]  ;;  %v115_v4 = vld [vmem:[#allocation5 + $0x8] sm:$0xff]  ;;  %s390_s1 = smov [#allocation7]   ;;  %vm201_vm2 = vcmask 80896  }
  0x28   :  { %279 = vmatprep.subr.bf16.mxu1 %v389_v1  ;;  %276 = vmatprep.mubr.msk.f32.mxu1 %vm388_vm0, %v387_v0  ;;  %v116_v5 = vld [vmem:[#allocation5 + $0x10] sm:$0xff]  ;;  %v117_v6 = vld [vmem:[#allocation5 + $0x18] sm:$0xff]  ;;  %v118_v7 = vld [vmem:[#allocation5 + $0x20] sm:$0xff]  ;;  %s209_s6 = sshll.u32 %s390_s1, 4  ;;  %s210_s6 = int_to_ptr.vmem [resolvable:$true] %s209_s6 }
  0x29   :  { %240 = vmatpush3.msra.mxu0 %v39_v2  ;;  %v280_v8 = vpack.c.bf16 %v116_v5, %v115_v4  ;;  %v283_v9 = vpack.c.bf16 %v118_v7, %v117_v6  ;;  %v119_v10 = vld [vmem:[#allocation5 + $0x28] sm:$0xff]  ;;  %v120_v11 = vld [vmem:[#allocation5 + $0x30] sm:$0xff]  ;;  %v121_v13 = vld [vmem:[#allocation5 + $0x38] sm:$0xff]  ;;  %s355_s7 = scalar_lea.vmem %s210_s6, 128  ;;  %p360_p3 = scmp.lt.s32.totalorder %s210_s6, %s210_s6 }
  0x2a   :  { %242 = vmatmul.mubr.msk.f32.vlgmr.msra.gmra.mrb[0].mxu0 %vm40_vm1, %v38_v3  ;;  %v286_v12 = vpack.c.bf16 %v120_v11, %v119_v10  ;;  %v122_v14 = vld [vmem:[#allocation5 + $0x40] sm:$0xff]  ;;  %v123_v16 = vld [vmem:[#allocation5 + $0x48] sm:$0xff]  ;;  %v124_v17 = vld [vmem:[#allocation5 + $0x50] sm:$0xff]  ;;  %p356_p2 = scmp.ne.s32.totalorder %s210_s6, %s355_s7  ;;  %p361_p4 = scmp.lt.s32.totalorder %s355_s7, %s355_s7 }
  0x2b   :  { %281 = vmatpush3.bf16.msra.mxu1 %v280_v8  ;;  %v289_v15 = vpack.c.bf16 %v122_v14, %v121_v13  ;;  %v292_v18 = vpack.c.bf16 %v124_v17, %v123_v16  ;;  %v125_v19 = vld [vmem:[#allocation5 + $0x58] sm:$0xff]  ;;  %v126_v20 = vld [vmem:[#allocation5 + $0x60] sm:$0xff]  ;;  %v127_v22 = vld [vmem:[#allocation5 + $0x68] sm:$0xff] }
  0x2c   :  { %282 = vmatprep.subr.bf16.mxu1 %v389_v1  ;;  %v295_v21 = vpack.c.bf16 %v126_v20, %v125_v19  ;;  %v128_v23 = vld [vmem:[#allocation5 + $0x70] sm:$0xff]  ;;  %v129_v25 = vld [vmem:[#allocation5 + $0x78] sm:$0xff]  ;;  %v130_v26 = vld [vmem:[#allocation5 + $0x80] sm:$0xff]  ;;  %p362_p5 = por %p361_p4, %p360_p3 }
  0x2d   :  { %v298_v24 = vpack.c.bf16 %v128_v23, %v127_v22  ;;  %v301_v27 = vpack.c.bf16 %v130_v26, %v129_v25 }
  0x2e   :  { %p363_p6 = pnand %p362_p5, %p356_p2 }
  0x2f   :  { %284 = vmatpush3.bf16.msra.mxu1 %v283_v9 }
  0x30   :  { %285 = vmatprep.subr.bf16.mxu1 %v389_v1 }
  0x33   :  { %287 = vmatpush3.bf16.msra.mxu1 %v286_v12 }
  0x34   :  { %288 = vmatprep.subr.bf16.mxu1 %v389_v1 }
  0x37   :  { %290 = vmatpush3.bf16.msra.mxu1 %v289_v15 }
  0x38   :  { %291 = vmatprep.subr.bf16.mxu1 %v389_v1 }
  0x3b   :  { %293 = vmatpush3.bf16.msra.mxu1 %v292_v18 }
  0x3c   :  { %294 = vmatprep.subr.bf16.mxu1 %v389_v1 }
  0x3f   :  { %296 = vmatpush3.bf16.msra.mxu1 %v295_v21 }
  0x40   :  { %297 = vmatprep.subr.bf16.mxu1 %v389_v1 }
  0x43   :  { %299 = vmatpush3.bf16.msra.mxu1 %v298_v24 }
  0x44   :  { %300 = vmatprep.subr.bf16.mxu1 %v389_v1 }
  0x47   :  { %302 = vmatpush3.bf16.msra.mxu1 %v301_v27 }
  0xfd   :  { %v110_v28 = vpop.f32.mrb[0].mxu0 }
  0xfe   :  { %v114_v29 = vmax.f32 %v110_v28, 0.0  ;;  %v243_v30 = vpop.f32.mrb[1].mxu0 }
 0x100   :  { %277 = vmatmul.mubr.f32.vlgmr.msra.gmra.mrb[0].mxu1 %v114_v29 }
 0x1d3   :  { %v197_v31 = vpop.f32.mrb[0].mxu1 }
 0x1d4   :  { %v278_v32 = vpop.f32.mrb[1].mxu1  ;;  %202 = vst.msk [vmem:[#allocation7] sm:$0xff] %vm201_vm2, %v197_v31 }
 0x1d5   :  { %366 = shalt.err (!%p363_p6)
}
 0x1d6   :  { %s367_s10 = scalar_lea.hbm %s451_s2, 128 }
 0x1d7   :  { %p368_p7 = scmp.ne.s32.totalorder %s451_s2, %s367_s10  ;;  %p371_p8 = scmp.lt.u32.totalorder %s367_s10, %s451_s2 }
 0x1d9   :  { %p373_p9 = pnand %p371_p8, %p368_p7 }
 0x1db   :  { %376 = shalt.err (!%p373_p9)
}
 0x1dc   :  { %212 = dma.vmem_to_hbm [thread:$0]  %s210_s6, 128, %s451_s2, [#allocation4]  }
 0x1dd   :  { %381 = dma.done.wait [#allocation4], 128  }
 0x1de   :  { %382 = vsyncadd [#allocation4], 4294967168 }
 0x1df   :  { %216 = vsyncpa [#allocation3], 1 }
 0x1e0   :  { %217 = vsyncpa [#allocation6], 1 }
 0x1e1   :  { %218 = vsyncpa [#allocation4], 1 }

</bundles_post_ra>
